<compile_context>
chip_gen: v5e
topology: v5e:2x2
jax: 0.10.0
libtpu: 0.0.40
codegen_flags: <defaults>
</compile_context>

<pallas_src>
import functools

import jax
import jax.numpy as jnp
import numpy as np
from jax.experimental import pallas as pl
from jax.experimental.pallas import tpu as pltpu


def _range_mae_kernel(x_ref, y_ref, w_ref, out_ref, acc_ref, *,
                      total_steps, guard_tail):
    j = pl.program_id(1)

    @pl.when(j == 0)
    def _init():
        acc_ref[...] = jnp.zeros_like(acc_ref)

    def _accum():
        d = jnp.abs(x_ref[...].astype(jnp.float32)
                    - y_ref[...].astype(jnp.float32))
        acc_ref[...] += d * w_ref[...]

    if guard_tail:
        # Odd total step count split across 2 cores: the very last (clamped,
        # duplicated) step must not be accumulated twice.
        g = pl.program_id(0) * pl.num_programs(1) + j

        @pl.when(g < total_steps)
        def _():
            _accum()
    else:
        _accum()

    # One cross-lane/sublane reduction per split, written lane-dense.
    @pl.when(j == pl.num_programs(1) - 1)
    def _finalize():
        out_ref[...] = jnp.full(out_ref.shape, jnp.sum(acc_ref[...]),
                                dtype=out_ref.dtype)


def _filtered_argmin_index(ppm, thresh):
    """Reproduces torch.argmin(ppm[ppm >= thresh]) with static shapes.

    Returns the position of the (first) minimum WITHIN the filtered array,
    i.e. the number of mask-true elements preceding the minimum masked element.
    (Like the torch module, this only selects the intended ppm window when the
    mask-true elements form a prefix, i.e. descending ppm axes.)
    """
    mask = ppm >= thresh
    masked = jnp.where(mask, ppm, jnp.inf)
    i = jnp.argmin(masked)
    return jnp.sum(mask & (jnp.arange(ppm.shape[0]) < i)).astype(jnp.int32)


def _pick_rows(batch, n, itemsize, max_block_elems):
    """Rows per block: a divisor of `batch`, ideally a multiple of the sublane
    pack (16 for 16-bit inputs, else 8), as large as the element budget allows.

    Falls back to the smallest packed divisor (ignoring the budget) or the full
    batch so the BlockSpec always satisfies the (8, 128) rule.
    """
    max_rows = max(1, max_block_elems // n)
    pack = 16 if itemsize <= 2 else 8
    divs = [d for d in range(1, batch + 1) if batch % d == 0]
    for p in (pack, 8):
        packed = [d for d in divs if d % p == 0]
        fitting = [d for d in packed if d <= max_rows]
        if fitting:
            return max(fitting)
        if packed:
            return min(packed)        # over budget, but keeps layout dense
    # TODO(synk): batch with no multiple-of-8 divisor and batch*N huge would
    # want zero-padding of the batch axis; full-batch block is used instead.
    return batch


@functools.partial(jax.jit, static_argnames=("max_block_elems",))
def range_mae_loss(x, y, ppm, *, max_block_elems=512 * 1024):
    """(gaba_mae * 8 + glx_mae + global_mae) / 10, as RangeMAELoss.forward.

    Precondition (same as the torch module): the GABA/Glx ppm windows must be
    non-empty, otherwise the result is NaN (division by an empty-window count).
    x / y may be float32 or bfloat16 (bf16 halves HBM traffic; compute is f32).
    """
    B, N = x.shape
    assert y.shape == (B, N)

    gaba_min = _filtered_argmin_index(ppm, 3.2)
    gaba_max = _filtered_argmin_index(ppm, 2.8)
    glx_min = _filtered_argmin_index(ppm, 3.95)
    glx_max = _filtered_argmin_index(ppm, 3.55)

    # Fold the three means, the 8/1/1 mix and the /10 into one per-column
    # weight:  loss = sum_{b,c} |x - y|[b, c] * w[c].
    col = jnp.arange(N, dtype=jnp.int32)
    in_gaba = ((col >= gaba_min) & (col < gaba_max)).astype(jnp.float32)
    in_glx = ((col >= glx_min) & (col < glx_max)).astype(jnp.float32)
    gaba_cnt = (gaba_max - gaba_min).astype(jnp.float32)
    glx_cnt = (glx_max - glx_min).astype(jnp.float32)
    bf = jnp.float32(B)
    w = (8.0 * in_gaba / (gaba_cnt * bf)
         + in_glx / (glx_cnt * bf)
         + 1.0 / (jnp.float32(N) * bf)) / 10.0

    x_isz = jnp.dtype(x.dtype).itemsize
    y_isz = jnp.dtype(y.dtype).itemsize
    tb = _pick_rows(B, N, max(x_isz, y_isz), max_block_elems)
    total_steps = B // tb
    num_splits = 2 if total_steps >= 2 else 1          # keep both v7x TCs busy
    steps_per_split = -(-total_steps // num_splits)    # cdiv
    guard_tail = (num_splits * steps_per_split != total_steps)

    # Weight pre-broadcast to the block's row count: constant block index ->
    # DMA'd once per core, VMEM-resident, no in-kernel sublane broadcast.
    w2 = jnp.broadcast_to(w[None, :], (tb, N))

    def in_map(s, j):
        g = s * steps_per_split + j
        if guard_tail:
            g = jnp.minimum(g, total_steps - 1)
        return (g, 0)

    kernel = functools.partial(_range_mae_kernel,
                               total_steps=total_steps, guard_tail=guard_tail)

    blk = tb * N
    bytes_accessed = B * N * (x_isz + y_isz) + blk * 4 + num_splits * 8 * 128 * 4
    cost = pl.CostEstimate(flops=5 * B * N, transcendentals=0,
                           bytes_accessed=bytes_accessed)

    vmem_need = (2 * blk * (x_isz + y_isz)   # double-buffered x / y blocks
                 + 2 * blk * 4               # weight (conservatively x2)
                 + blk * 4                   # f32 accumulator scratch
                 + (1 << 20))                # out tile + internal slack
    vmem_limit = int(max(vmem_need, 8 << 20))

    partial_sums = pl.pallas_call(
        kernel,
        out_shape=jax.ShapeDtypeStruct((num_splits, 8, 128), jnp.float32),
        grid_spec=pltpu.PrefetchScalarGridSpec(
            num_scalar_prefetch=0,
            grid=(num_splits, steps_per_split),
            in_specs=[
                pl.BlockSpec((tb, N), in_map),
                pl.BlockSpec((tb, N), in_map),
                pl.BlockSpec((tb, N), lambda s, j: (0, 0)),   # resident weight
            ],
            out_specs=pl.BlockSpec((1, 8, 128), lambda s, j: (s, 0, 0)),
            scratch_shapes=[pltpu.VMEM((tb, N), jnp.float32)],
        ),
        compiler_params=pltpu.CompilerParams(
            dimension_semantics=("parallel", "arbitrary"),
            vmem_limit_bytes=vmem_limit),
        cost_estimate=cost,
    )(x, y, w2)

    return jnp.sum(partial_sums[:, 0, 0])


def _reference(x, y, ppm):
    x = np.asarray(x, dtype=np.float64)
    y = np.asarray(y, dtype=np.float64)
    ppm = np.asarray(ppm)

    def ind(t):
        filt = ppm[ppm >= t]
        return int(np.argmin(filt))

    gmin, gmax = ind(3.2), ind(2.8)
    xmin, xmax = ind(3.95), ind(3.55)
    gaba = np.abs(x[:, gmin:gmax] - y[:, gmin:gmax]).mean()
    glx = np.abs(x[:, xmin:xmax] - y[:, xmin:xmax]).mean()
    glob = np.abs(x - y).mean()
    return (gaba * 8.0 + glx + glob) / 10.0


if __name__ == "__main__":
    B, N = 24, 1024
    key = jax.random.PRNGKey(0)
    kx, ky = jax.random.split(key)
    x = jax.random.normal(kx, (B, N), dtype=jnp.float32)
    y = jax.random.normal(ky, (B, N), dtype=jnp.float32)
    # Typical MRS spectral axis: descending ppm values.
    ppm = jnp.linspace(4.5, 0.5, N, dtype=jnp.float32)

    ref = _reference(x, y, ppm)

    # Default config: whole batch in one resident block, single step.
    loss = jax.block_until_ready(range_mae_loss(x, y, ppm))
    assert np.allclose(np.asarray(loss), ref, rtol=1e-4, atol=1e-6), (loss, ref)

    # Forced small blocks: multi-step accumulator carry, 2-way "parallel"
    # split, odd step count exercising the clamped-index tail guard.
    loss2 = jax.block_until_ready(
        range_mae_loss(x, y, ppm, max_block_elems=8 * 1024))
    assert np.allclose(np.asarray(loss2), ref, rtol=1e-4, atol=1e-6), (loss2, ref)

    # bfloat16 inputs (half the HBM traffic); reference recomputed from the
    # rounded values so only f32 accumulation differs.
    xb = x.astype(jnp.bfloat16)
    yb = y.astype(jnp.bfloat16)
    ref_b = _reference(np.asarray(jnp.asarray(xb, jnp.float32)),
                       np.asarray(jnp.asarray(yb, jnp.float32)), ppm)
    loss3 = jax.block_until_ready(range_mae_loss(xb, yb, ppm))
    assert np.allclose(np.asarray(loss3), ref_b, rtol=1e-4, atol=1e-6), (loss3, ref_b)
    loss4 = jax.block_until_ready(
        range_mae_loss(xb, yb, ppm, max_block_elems=8 * 1024))
    assert np.allclose(np.asarray(loss4), ref_b, rtol=1e-4, atol=1e-6), (loss4, ref_b)

    print("KERNEL_OK")
</pallas_src>

<mosaic_0001>
module attributes {stable_mosaic.version = 11 : i64} {
  func.func @_range_mae_kernel(%arg0: i32, %arg1: i32, %arg2: memref<24x1024xf32, #tpu.memory_space<vmem>>, %arg3: memref<24x1024xf32, #tpu.memory_space<vmem>>, %arg4: memref<24x1024xf32, #tpu.memory_space<vmem>>, %arg5: memref<1x8x128xf32, #tpu.memory_space<vmem>>, %arg6: memref<24x1024xf32, #tpu.memory_space<vmem>>) attributes {dimension_semantics = [#tpu.dimension_semantics<parallel>, #tpu.dimension_semantics<arbitrary>], iteration_bounds = array<i64: 1, 1>, scalar_prefetch = 0 : i64, scratch_operands = 1 : i64, tpu.core_type = #tpu.core_type<tc>, window_params = [{transform_indices = @transform_0, window_bounds = array<i64: 24, 1024>}, {transform_indices = @transform_1, window_bounds = array<i64: 24, 1024>}, {pipeline_mode = #tpu.pipeline_mode<synchronous>, transform_indices = @transform_2, window_bounds = array<i64: 24, 1024>}, {transform_indices = @transform_3, window_bounds = array<i64: 1, 8, 128>}]} {
    %c0_i32 = arith.constant 0 : i32
    %0 = arith.cmpi eq, %arg1, %c0_i32 : i32
    %1 = arith.extui %0 : i1 to i32
    %c0_i32_0 = arith.constant 0 : i32
    %2 = arith.cmpi ne, %1, %c0_i32_0 : i32
    scf.if %2 {
      %cst = arith.constant 0.000000e+00 : f32
      %15 = vector.broadcast %cst : f32 to vector<24x1024xf32>
      %c0_12 = arith.constant 0 : index
      %c0_13 = arith.constant 0 : index
      %16 = vector.load %arg6[%c0_12, %c0_13] : memref<24x1024xf32, #tpu.memory_space<vmem>>, vector<24x1024xf32>
      tpu.vector_store %arg6[%c0_12, %c0_13], %15 {strides = array<i32>} : memref<24x1024xf32, #tpu.memory_space<vmem>>, vector<24x1024xf32>,
    } else {
    }
    %c0 = arith.constant 0 : index
    %c0_1 = arith.constant 0 : index
    %3 = vector.load %arg2[%c0, %c0_1] : memref<24x1024xf32, #tpu.memory_space<vmem>>, vector<24x1024xf32>
    %c0_2 = arith.constant 0 : index
    %c0_3 = arith.constant 0 : index
    %4 = vector.load %arg3[%c0_2, %c0_3] : memref<24x1024xf32, #tpu.memory_space<vmem>>, vector<24x1024xf32>
    %5 = arith.subf %3, %4 : vector<24x1024xf32>
    %6 = math.absf %5 : vector<24x1024xf32>
    %c0_4 = arith.constant 0 : index
    %c0_5 = arith.constant 0 : index
    %7 = vector.load %arg6[%c0_4, %c0_5] : memref<24x1024xf32, #tpu.memory_space<vmem>>, vector<24x1024xf32>
    %c0_6 = arith.constant 0 : index
    %c0_7 = arith.constant 0 : index
    %8 = vector.load %arg4[%c0_6, %c0_7] : memref<24x1024xf32, #tpu.memory_space<vmem>>, vector<24x1024xf32>
    %9 = arith.mulf %6, %8 : vector<24x1024xf32>
    %10 = arith.addf %7, %9 : vector<24x1024xf32>
    %c0_8 = arith.constant 0 : index
    %c0_9 = arith.constant 0 : index
    %11 = vector.load %arg6[%c0_8, %c0_9] : memref<24x1024xf32, #tpu.memory_space<vmem>>, vector<24x1024xf32>
    tpu.vector_store %arg6[%c0_8, %c0_9], %10 {strides = array<i32>} : memref<24x1024xf32, #tpu.memory_space<vmem>>, vector<24x1024xf32>,
    %c0_i32_10 = arith.constant 0 : i32
    %12 = arith.cmpi eq, %arg1, %c0_i32_10 : i32
    %13 = arith.extui %12 : i1 to i32
    %c0_i32_11 = arith.constant 0 : i32
    %14 = arith.cmpi ne, %13, %c0_i32_11 : i32
    scf.if %14 {
      %c0_12 = arith.constant 0 : index
      %c0_13 = arith.constant 0 : index
      %15 = vector.load %arg6[%c0_12, %c0_13] : memref<24x1024xf32, #tpu.memory_space<vmem>>, vector<24x1024xf32>
      %16 = vector.shape_cast %15 : vector<24x1024xf32> to vector<1x24x1024xf32>
      %cst = arith.constant dense<0.000000e+00> : vector<1xf32>
      %17 = vector.multi_reduction <add>, %16, %cst [1, 2] : vector<1x24x1024xf32> to vector<1xf32>
      %18 = vector.shape_cast %17 : vector<1xf32> to vector<1x1x1xf32>
      %19 = vector.extract %18[0, 0, 0] : f32 from vector<1x1x1xf32>
      %20 = vector.broadcast %19 : f32 to vector<1x8x128xf32>
      %c0_14 = arith.constant 0 : index
      %c0_15 = arith.constant 0 : index
      %c0_16 = arith.constant 0 : index
      %21 = vector.load %arg5[%c0_14, %c0_15, %c0_16] : memref<1x8x128xf32, #tpu.memory_space<vmem>>, vector<1x8x128xf32>
      tpu.vector_store %arg5[%c0_14, %c0_15, %c0_16], %20 {strides = array<i32>} : memref<1x8x128xf32, #tpu.memory_space<vmem>>, vector<1x8x128xf32>,
    } else {
    }
    return
  }
  func.func @transform_0(%arg0: i32, %arg1: i32) -> (i32, i32) {
    %c1_i32 = arith.constant 1 : i32
    %0 = arith.muli %arg0, %c1_i32 : i32
    %1 = arith.addi %0, %arg1 : i32
    %c0_i32 = arith.constant 0 : i32
    %c0_i32_0 = arith.constant 0 : i32
    return %1, %c0_i32 : i32, i32
  }
  func.func @transform_1(%arg0: i32, %arg1: i32) -> (i32, i32) {
    %c1_i32 = arith.constant 1 : i32
    %0 = arith.muli %arg0, %c1_i32 : i32
    %1 = arith.addi %0, %arg1 : i32
    %c0_i32 = arith.constant 0 : i32
    %c0_i32_0 = arith.constant 0 : i32
    return %1, %c0_i32 : i32, i32
  }
  func.func @transform_2(%arg0: i32, %arg1: i32) -> (i32, i32) {
    %c0_i32 = arith.constant 0 : i32
    %c0_i32_0 = arith.constant 0 : i32
    %c0_i32_1 = arith.constant 0 : i32
    return %c0_i32, %c0_i32_0 : i32, i32
  }
  func.func @transform_3(%arg0: i32, %arg1: i32) -> (i32, i32, i32) {
    %c0_i32 = arith.constant 0 : i32
    %c0_i32_0 = arith.constant 0 : i32
    %c0_i32_1 = arith.constant 0 : i32
    return %arg0, %c0_i32, %c0_i32_0 : i32, i32, i32
  }
}

</mosaic_0001>

<bundles_post_ra>
// kernel: range_mae_loss.1
= control target key start
LH: loop header
LB: loop body
LE: loop exit
PB: predicated region body
PF: predicated region fallthrough
CT: control target
= control target key end

     0   :  { %8 = vsyncpa [#allocation4], 0  ;;  %s409_s15 = smov [#allocation3]   ;;  %s410_s17 = smov 1024   ;;  %s582_s0 = inlined_call_operand.vmem [shape: f32[24,1024], index: 0, kind: input, shape index: {}]   ;;  %s583_s1 = inlined_call_operand.hbm [shape: f32[24,1024], index: 1, kind: input, shape index: {}]   ;;  %s584_s2 = inlined_call_operand.vmem [shape: f32[24,1024], index: 2, kind: input, shape index: {}]   ;;  %s585_s3 = inlined_call_operand.vmem [shape: f32[1,8,128], index: 3, kind: output, shape index: {}]  }
   0x1   :  { %s29_s14 = sshll.u32 %s583_s1, 4  ;;  %s31_s16 = sshll.u32 %s409_s15, 4  ;;  %s30_s14 = int_to_ptr.hbm [resolvable:$true] %s29_s14  ;;  %s32_s16 = int_to_ptr.vmem [resolvable:$true] %s31_s16 }
   0x2   :  { %s411_s18 = smov 64  }
   0x3   :  { %37 = dma.hbm_to_vmem [thread:$0]  %s30_s14, 3072, %s32_s16, [#allocation4], %s410_s17, %s410_s17, %s411_s18  }
   0x4   :  { %407 = dma.done.wait [#allocation4], 3072  }
   0x5   :  { %408 = vsyncadd [#allocation4], 4294964224  ;;  %v90_v0 = vld [vmem:[%s582_s0] sm:$0xff]  ;;  %v91_v1 = vld [vmem:[%s582_s0 + $0x8] sm:$0xff] }
   0x6   :  { %v92_v2 = vld [vmem:[%s582_s0 + $0x10] sm:$0xff]  ;;  %v114_v3 = vld [vmem:[#allocation3] sm:$0xff]  ;;  %v115_v4 = vld [vmem:[#allocation3 + $0x8] sm:$0xff] }
   0x7   :  { %v116_v5 = vld [vmem:[#allocation3 + $0x10] sm:$0xff]  ;;  %v138_v6 = vsub.f32 %v90_v0, %v114_v3  ;;  %v139_v7 = vsub.f32 %v91_v1, %v115_v4  ;;  %v93_v9 = vld [vmem:[%s582_s0 + $0x18] sm:$0xff]  ;;  %v94_v10 = vld [vmem:[%s582_s0 + $0x20] sm:$0xff] }
   0x8   :  { %v140_v8 = vsub.f32 %v92_v2, %v116_v5  ;;  %v117_v11 = vld [vmem:[#allocation3 + $0x18] sm:$0xff]  ;;  %v118_v12 = vld [vmem:[#allocation3 + $0x20] sm:$0xff]  ;;  %v95_v15 = vld [vmem:[%s582_s0 + $0x28] sm:$0xff] }
   0x9   :  { %v162_v13 = vand.u32 2147483647, %v138_v6  ;;  %v163_v14 = vand.u32 2147483647, %v139_v7  ;;  %v119_v16 = vld [vmem:[#allocation3 + $0x28] sm:$0xff]  ;;  %v141_v18 = vsub.f32 %v93_v9, %v117_v11  ;;  %v142_v19 = vsub.f32 %v94_v10, %v118_v12  ;;  %v210_v20 = vld [vmem:[%s584_s2] sm:$0xff] }
   0xa   :  { %v164_v17 = vand.u32 2147483647, %v140_v8  ;;  %v211_v21 = vld [vmem:[%s584_s2 + $0x8] sm:$0xff]  ;;  %v212_v22 = vld [vmem:[%s584_s2 + $0x10] sm:$0xff]  ;;  %v143_v26 = vsub.f32 %v95_v15, %v119_v16  ;;  %v97_v28 = vld [vmem:[%s582_s0 + $0x38] sm:$0xff] }
   0xb   :  { %v96_v23 = vld [vmem:[%s582_s0 + $0x30] sm:$0xff]  ;;  %v234_v25 = vmul.f32 %v210_v20, %v162_v13  ;;  %v235_v27 = vmul.f32 %v211_v21, %v163_v14  ;;  %v121_v29 = vld [vmem:[#allocation3 + $0x38] sm:$0xff]  ;;  %v165_v32 = vand.u32 2147483647, %v141_v18  ;;  %v166_v33 = vand.u32 2147483647, %v142_v19 }
   0xc   :  { %v120_v24 = vld [vmem:[#allocation3 + $0x30] sm:$0xff]  ;;  %v236_v30 = vmul.f32 %v212_v22, %v164_v17  ;;  %v98_v35 = vld [vmem:[%s582_s0 + $0x40] sm:$0xff]  ;;  %v99_v37 = vld [vmem:[%s582_s0 + $0x48] sm:$0xff]  ;;  %v145_v39 = vsub.f32 %v97_v28, %v121_v29  ;;  %v167_v40 = vand.u32 2147483647, %v143_v26 }
   0xd   :  { %v144_v31 = vsub.f32 %v96_v23, %v120_v24  ;;  %v333_v34 = vadd.f32 %v235_v27, %v234_v25  ;;  %v122_v36 = vld [vmem:[#allocation3 + $0x40] sm:$0xff]  ;;  %v123_v38 = vld [vmem:[#allocation3 + $0x48] sm:$0xff]  ;;  %v213_v42 = vld [vmem:[%s584_s2 + $0x18] sm:$0xff] }
   0xe   :  { %v214_v43 = vld [vmem:[%s584_s2 + $0x20] sm:$0xff]  ;;  %v215_v44 = vld [vmem:[%s584_s2 + $0x28] sm:$0xff]  ;;  %v146_v45 = vsub.f32 %v98_v35, %v122_v36  ;;  %v237_v47 = vmul.f32 %v213_v42, %v165_v32  ;;  %v100_v49 = vld [vmem:[%s582_s0 + $0x50] sm:$0xff]  ;;  %v147_v52 = vsub.f32 %v99_v37, %v123_v38  ;;  %v169_v53 = vand.u32 2147483647, %v145_v39 }
   0xf   :  { %v334_v41 = vadd.f32 %v333_v34, %v236_v30  ;;  %v168_v46 = vand.u32 2147483647, %v144_v31  ;;  %v238_v48 = vmul.f32 %v214_v43, %v166_v33  ;;  %v124_v50 = vld [vmem:[#allocation3 + $0x50] sm:$0xff]  ;;  %v239_v54 = vmul.f32 %v215_v44, %v167_v40  ;;  %v101_v56 = vld [vmem:[%s582_s0 + $0x58] sm:$0xff]  ;;  %v102_v63 = vld [vmem:[%s582_s0 + $0x60] sm:$0xff] }
  0x10   :  { %v216_v51 = vld [vmem:[%s584_s2 + $0x30] sm:$0xff]  ;;  %v125_v57 = vld [vmem:[#allocation3 + $0x58] sm:$0xff]  ;;  %v148_v59 = vsub.f32 %v100_v49, %v124_v50  ;;  %v170_v60 = vand.u32 2147483647, %v146_v45  ;;  %v126_v0 = vld [vmem:[#allocation3 + $0x60] sm:$0xff] }
  0x11   :  { %v335_v55 = vadd.f32 %v334_v41, %v237_v47  ;;  %v217_v58 = vld [vmem:[%s584_s2 + $0x38] sm:$0xff]  ;;  %v240_v61 = vmul.f32 %v216_v51, %v168_v46  ;;  %v218_v1 = vld [vmem:[%s584_s2 + $0x40] sm:$0xff]  ;;  %v149_v2 = vsub.f32 %v101_v56, %v125_v57  ;;  %v171_v3 = vand.u32 2147483647, %v147_v52  ;;  %v103_v6 = vld [vmem:[%s582_s0 + $0x68] sm:$0xff] }
  0x12   :  { %v241_v4 = vmul.f32 %v217_v58, %v169_v53  ;;  %v127_v7 = vld [vmem:[#allocation3 + $0x68] sm:$0xff]  ;;  %v150_v9 = vsub.f32 %v102_v63, %v126_v0  ;;  %v172_v10 = vand.u32 2147483647, %v148_v59  ;;  %v242_v11 = vmul.f32 %v218_v1, %v170_v60  ;;  %v104_v13 = vld [vmem:[%s582_s0 + $0x70] sm:$0xff]  ;;  %v105_v20 = vld [vmem:[%s582_s0 + $0x78] sm:$0xff] }
  0x13   :  { %v336_v62 = vadd.f32 %v335_v55, %v238_v48  ;;  %v219_v8 = vld [vmem:[%s584_s2 + $0x48] sm:$0xff]  ;;  %v128_v14 = vld [vmem:[#allocation3 + $0x70] sm:$0xff]  ;;  %v151_v16 = vsub.f32 %v103_v6, %v127_v7  ;;  %v173_v17 = vand.u32 2147483647, %v149_v2  ;;  %v129_v21 = vld [vmem:[#allocation3 + $0x78] sm:$0xff] }
  0x14   :  { %v220_v15 = vld [vmem:[%s584_s2 + $0x50] sm:$0xff]  ;;  %v243_v18 = vmul.f32 %v219_v8, %v171_v3  ;;  %v221_v22 = vld [vmem:[%s584_s2 + $0x58] sm:$0xff]  ;;  %v152_v23 = vsub.f32 %v104_v13, %v128_v14  ;;  %v174_v24 = vand.u32 2147483647, %v150_v9  ;;  %v106_v27 = vld [vmem:[%s582_s0 + $0x80] sm:$0xff]  ;;  %v153_v30 = vsub.f32 %v105_v20, %v129_v21 }
  0x15   :  { %v337_v5 = vadd.f32 %v336_v62, %v239_v54  ;;  %v244_v25 = vmul.f32 %v220_v15, %v172_v10  ;;  %v130_v28 = vld [vmem:[#allocation3 + $0x80] sm:$0xff]  ;;  %v175_v31 = vand.u32 2147483647, %v151_v16  ;;  %v245_v32 = vmul.f32 %v221_v22, %v173_v17  ;;  %v107_v34 = vld [vmem:[%s582_s0 + $0x88] sm:$0xff]  ;;  %v108_v41 = vld [vmem:[%s582_s0 + $0x90] sm:$0xff] }
  0x16   :  { %v222_v29 = vld [vmem:[%s584_s2 + $0x60] sm:$0xff]  ;;  %v131_v35 = vld [vmem:[#allocation3 + $0x88] sm:$0xff]  ;;  %v154_v37 = vsub.f32 %v106_v27, %v130_v28  ;;  %v176_v38 = vand.u32 2147483647, %v152_v23  ;;  %v132_v42 = vld [vmem:[#allocation3 + $0x90] sm:$0xff] }
  0x17   :  { %v338_v12 = vadd.f32 %v337_v5, %v240_v61  ;;  %v223_v36 = vld [vmem:[%s584_s2 + $0x68] sm:$0xff]  ;;  %v246_v39 = vmul.f32 %v222_v29, %v174_v24  ;;  %v224_v43 = vld [vmem:[%s584_s2 + $0x70] sm:$0xff]  ;;  %v155_v44 = vsub.f32 %v107_v34, %v131_v35  ;;  %v177_v45 = vand.u32 2147483647, %v153_v30  ;;  %v109_v48 = vld [vmem:[%s582_s0 + $0x98] sm:$0xff] }
  0x18   :  { %v247_v46 = vmul.f32 %v223_v36, %v175_v31  ;;  %v133_v49 = vld [vmem:[#allocation3 + $0x98] sm:$0xff]  ;;  %v156_v51 = vsub.f32 %v108_v41, %v132_v42  ;;  %v178_v52 = vand.u32 2147483647, %v154_v37  ;;  %v248_v53 = vmul.f32 %v224_v43, %v176_v38  ;;  %v110_v55 = vld [vmem:[%s582_s0 + $0xa0] sm:$0xff]  ;;  %v111_v62 = vld [vmem:[%s582_s0 + $0xa8] sm:$0xff] }
  0x19   :  { %v339_v19 = vadd.f32 %v338_v12, %v241_v4  ;;  %v225_v50 = vld [vmem:[%s584_s2 + $0x78] sm:$0xff]  ;;  %v134_v56 = vld [vmem:[#allocation3 + $0xa0] sm:$0xff]  ;;  %v157_v58 = vsub.f32 %v109_v48, %v133_v49  ;;  %v179_v59 = vand.u32 2147483647, %v155_v44  ;;  %v135_v63 = vld [vmem:[#allocation3 + $0xa8] sm:$0xff] }
  0x1a   :  { %v226_v57 = vld [vmem:[%s584_s2 + $0x80] sm:$0xff]  ;;  %v249_v60 = vmul.f32 %v225_v50, %v177_v45  ;;  %v227_v0 = vld [vmem:[%s584_s2 + $0x88] sm:$0xff]  ;;  %v158_v1 = vsub.f32 %v110_v55, %v134_v56  ;;  %v180_v2 = vand.u32 2147483647, %v156_v51  ;;  %v112_v5 = vld [vmem:[%s582_s0 + $0xb0] sm:$0xff]  ;;  %v159_v8 = vsub.f32 %v111_v62, %v135_v63 }
  0x1b   :  { %v340_v26 = vadd.f32 %v339_v19, %v242_v11  ;;  %v250_v3 = vmul.f32 %v226_v57, %v178_v52  ;;  %v136_v6 = vld [vmem:[#allocation3 + $0xb0] sm:$0xff]  ;;  %v181_v9 = vand.u32 2147483647, %v157_v58  ;;  %v251_v10 = vmul.f32 %v227_v0, %v179_v59  ;;  %v113_v12 = vld [vmem:[%s582_s0 + $0xb8] sm:$0xff]  ;;  %v230_v19 = vld [vmem:[%s584_s2 + $0xa0] sm:$0xff] }
  0x1c   :  { %v228_v7 = vld [vmem:[%s584_s2 + $0x90] sm:$0xff]  ;;  %v137_v13 = vld [vmem:[#allocation3 + $0xb8] sm:$0xff]  ;;  %v160_v15 = vsub.f32 %v112_v5, %v136_v6  ;;  %v182_v16 = vand.u32 2147483647, %v158_v1  ;;  %v183_v21 = vand.u32 2147483647, %v159_v8 }
  0x1d   :  { %v341_v33 = vadd.f32 %v340_v26, %v243_v18  ;;  %v229_v14 = vld [vmem:[%s584_s2 + $0x98] sm:$0xff]  ;;  %v252_v17 = vmul.f32 %v228_v7, %v180_v2  ;;  %v161_v20 = vsub.f32 %v113_v12, %v137_v13  ;;  %v231_v24 = vld [vmem:[%s584_s2 + $0xa8] sm:$0xff]  ;;  %v232_v28 = vld [vmem:[%s584_s2 + $0xb0] sm:$0xff] }
  0x1e   :  { %v253_v22 = vmul.f32 %v229_v14, %v181_v9  ;;  %v254_v26 = vmul.f32 %v230_v19, %v182_v16  ;;  %v255_v30 = vmul.f32 %v231_v24, %v183_v21 }
  0x1f   :  { %v342_v40 = vadd.f32 %v341_v33, %v244_v25  ;;  %v184_v25 = vand.u32 2147483647, %v160_v15  ;;  %v185_v29 = vand.u32 2147483647, %v161_v20 }
  0x21   :  { %v343_v47 = vadd.f32 %v342_v40, %v245_v32  ;;  %v233_v32 = vld [vmem:[%s584_s2 + $0xb8] sm:$0xff]  ;;  %v256_v33 = vmul.f32 %v232_v28, %v184_v25 }
  0x22   :  { %v257_v35 = vmul.f32 %v233_v32, %v185_v29 }
  0x23   :  { %v344_v54 = vadd.f32 %v343_v47, %v246_v39 }
  0x25   :  { %v345_v61 = vadd.f32 %v344_v54, %v247_v46 }
  0x27   :  { %v346_v4 = vadd.f32 %v345_v61, %v248_v53 }
  0x29   :  { %v347_v11 = vadd.f32 %v346_v4, %v249_v60 }
  0x2b   :  { %v348_v18 = vadd.f32 %v347_v11, %v250_v3 }
  0x2d   :  { %v349_v23 = vadd.f32 %v348_v18, %v251_v10 }
  0x2f   :  { %v350_v27 = vadd.f32 %v349_v23, %v252_v17 }
  0x31   :  { %v351_v31 = vadd.f32 %v350_v27, %v253_v22 }
  0x33   :  { %v352_v34 = vadd.f32 %v351_v31, %v254_v26 }
  0x35   :  { %v353_v36 = vadd.f32 %v352_v34, %v255_v30 }
  0x37   :  { %v354_v37 = vadd.f32 %v353_v36, %v256_v33 }
  0x39   :  { %v355_v38 = vadd.f32 %v354_v37, %v257_v35 }
  0x3b   :  { %356 = vadd.xlane.f32.xlu0 %v355_v38 }
  0xae   :  { %v357_v39 = vpop.xlane.xlu0 %356 }
  0xaf   :  { %v358_v40 = vrot.slane %v357_v39, 4 }
  0xb1   :  { %v359_v41 = vadd.f32 %v358_v40, %v357_v39 }
  0xb3   :  { %v360_v42 = vrot.slane %v359_v41, 2 }
  0xb5   :  { %v361_v43 = vadd.f32 %v360_v42, %v359_v41 }
  0xb7   :  { %v362_v44 = vrot.slane %v361_v43, 1 }
  0xb9   :  { %v363_v45 = vadd.f32 %v362_v44, %v361_v43 }
  0xbb   :  { %378 = vpush %v363_v45 }
  0xec   :  { %s379_s29 = spop %378 }
  0xed   :  { %v365_v46 = vstv %s379_s29 }
  0xee   :  { %366 = vst [vmem:[%s585_s3] sm:$0xff] %v365_v46 }
  0xef   :  { %371 = vsyncpa [#allocation4], 1 }

</bundles_post_ra>
